<compile_context>
chip_gen: v6e
topology: v6e:2x2x1
jax: 0.10.0
libtpu: 0.0.40
codegen_flags: <defaults>
</compile_context>

<pallas_src>
import jax
import jax.numpy as jnp
from jax import lax
from jax.experimental import pallas as pl
from jax.experimental.pallas import tpu as pltpu


def _vmem_budget():
    """(per-input block byte cap, scoped vmem_limit_bytes), per TPU generation."""
    phys = 0
    try:
        phys = int(getattr(pltpu.get_tpu_info(), "vmem_capacity_bytes", 0) or 0)
    except Exception:
        phys = 0
    if phys >= 96 * 1024 * 1024:          # v4/v5e/v6e class: 128 MiB VMEM
        return 8 * 1024 * 1024, 96 * 1024 * 1024
    # v7x class (64 MiB VMEM) or unknown: stay conservative.
    return 4 * 1024 * 1024, 48 * 1024 * 1024


def _make_kernel(C, H, W, bh, tiled):
    """Kernel over (gn, C, bh, W) blocks of whole-width image rows."""
    inv_c = 1.0 / C

    def chan_mean(ref):
        # Unrolled per-channel accumulate: never materializes a full-block f32
        # copy; the largest temp is one (gn, bh, W) f32 array (review item).
        m = ref[:, 0, :, :].astype(jnp.float32)
        for c in range(1, C):
            m = m + ref[:, c, :, :].astype(jnp.float32)
        return m * inv_c

    def col_taps(sx, dv):
        # Horizontal Sobel taps; output column j corresponds to image column
        # j + 1.  TODO(synk): switch to pltpu.roll lane rotations (v7x).
        gx = sx[:, :, 0:W - 2] - sx[:, :, 2:W]
        gy = dv[:, :, 0:W - 2] + 2.0 * dv[:, :, 1:W - 1] + dv[:, :, 2:W]
        return gy, gx

    if tiled:
        def kernel(inpt_ref, tar_ref, out_ref, carry_i_ref, carry_t_ref):
            h = pl.program_id(1)

            @pl.when(h == 0)
            def _():
                out_ref[...] = jnp.zeros_like(out_ref)

            def bands(ref, carry_ref):
                m = chan_mean(ref)                          # (gn, bh, W)
                prev = carry_ref[...]                       # last 8 mean rows of block h-1
                full = jnp.concatenate([prev, m], axis=1)   # (gn, bh + 8, W), aligned concat
                carry_ref[...] = m[:, bh - 8:bh, :]         # carry for block h + 1
                # Output row r of this block is image row  g = h*bh + r - 1.
                top = full[:, 6:bh + 6, :]                  # mean row g - 1
                mid = full[:, 7:bh + 7, :]                  # mean row g
                bot = full[:, 8:bh + 8, :]                  # mean row g + 1
                sx = top + 2.0 * mid + bot                  # vertical [1,2,1]  -> grad_x
                dv = top - bot                              # vertical [1,0,-1] -> grad_y
                return col_taps(sx, dv)

            gy_t, gx_t = bands(tar_ref, carry_t_ref)
            gy_i, gx_i = bands(inpt_ref, carry_i_ref)
            d = jnp.abs(gy_t - gy_i) + jnp.abs(gx_t - gx_i)  # (gn, bh, W-2)

            r = lax.broadcasted_iota(jnp.int32, d.shape, 1)
            c = lax.broadcasted_iota(jnp.int32, d.shape, 2) + 1
            g = r + (h * bh - 1)
            # [2:-2, 2:-2] crop; rows outside [2, H-3] also cover the stale
            # carry of the first block and padded rows of a partial last
            # block (select, not multiply: NaN/Inf garbage never reaches the sum).
            keep = (g >= 2) & (g <= H - 3) & (c >= 2) & (c <= W - 3)
            out_ref[...] = out_ref[...] + jnp.sum(jnp.where(keep, d, 0.0))

    else:
        def kernel(inpt_ref, tar_ref, out_ref):
            def bands(ref):
                m = chan_mean(ref)                          # (gn, H, W)
                top = m[:, 0:H - 2, :]                      # mean row g - 1, g = r + 1
                mid = m[:, 1:H - 1, :]
                bot = m[:, 2:H, :]
                sx = top + 2.0 * mid + bot
                dv = top - bot
                return col_taps(sx, dv)

            gy_t, gx_t = bands(tar_ref)
            gy_i, gx_i = bands(inpt_ref)
            d = jnp.abs(gy_t - gy_i) + jnp.abs(gx_t - gx_i)  # (gn, H-2, W-2)

            r = lax.broadcasted_iota(jnp.int32, d.shape, 1)
            c = lax.broadcasted_iota(jnp.int32, d.shape, 2) + 1
            g = r + 1
            keep = (g >= 2) & (g <= H - 3) & (c >= 2) & (c <= W - 3)
            s = jnp.sum(jnp.where(keep, d, 0.0))
            # Lane-dense (1, 8, 128) partial-sum block -> unmasked vector store.
            out_ref[...] = jnp.broadcast_to(s, out_ref.shape)

    return kernel


def grad_loss(inpt, tar, *, _row_block=None):
    """GradLoss.forward: mean L1 between Sobel gradients of inpt and tar."""
    assert inpt.shape == tar.shape
    N, C, H, W = inpt.shape
    assert H > 4 and W > 4, "the [2:-2, 2:-2] crop needs H, W >= 5"

    itemsize = jnp.dtype(inpt.dtype).itemsize
    cap, vmem_limit = _vmem_budget()
    per_img = C * H * W * itemsize

    # Images per block: a divisor of N (no partially-valid image blocks),
    # capped by the block-byte budget and by ceil(N/2) so there are always
    # >= 2 batch grid steps when N >= 2 (megacore sharding / DMA overlap).
    # TODO(synk): allow non-divisor gn with an image-index mask for prime N.
    limit = max(1, min(cap // max(per_img, 1), (N + 1) // 2))
    gn = max(d for d in range(1, min(limit, N) + 1) if N % d == 0)

    # Rows per block: the whole image if it fits the budget, otherwise a
    # multiple of 8 (an 8-row channel-mean carry stitches adjacent row blocks).
    if _row_block is not None:
        bh = _row_block
    elif gn * per_img <= cap:
        bh = H
    else:
        row_bytes = C * W * itemsize
        bh = min(H, max(8, (cap // max(row_bytes, 1)) // 8 * 8))
    tiled = bh < H
    assert (not tiled) or (bh % 8 == 0 and bh >= 8)

    num_n = pl.cdiv(N, gn)
    if tiled:
        num_h = pl.cdiv(H, bh)
        grid = (num_n, num_h)
        in_spec = pl.BlockSpec((gn, C, bh, W), lambda n, h: (n, 0, h, 0))
        out_spec = pl.BlockSpec((1, 8, 128), lambda n, h: (n, 0, 0))
        scratch = [pltpu.VMEM((gn, 8, W), jnp.float32),
                   pltpu.VMEM((gn, 8, W), jnp.float32)]
        dims = ("parallel", "arbitrary")
    else:
        grid = (num_n,)
        in_spec = pl.BlockSpec((gn, C, H, W), lambda n: (n, 0, 0, 0))
        out_spec = pl.BlockSpec((1, 8, 128), lambda n: (n, 0, 0))
        scratch = []
        dims = ("parallel",)

    partials = pl.pallas_call(
        _make_kernel(C, H, W, bh, tiled),
        out_shape=jax.ShapeDtypeStruct((num_n, 8, 128), jnp.float32),
        grid_spec=pltpu.PrefetchScalarGridSpec(
            num_scalar_prefetch=0,
            grid=grid,
            in_specs=[in_spec, in_spec],
            out_specs=out_spec,
            scratch_shapes=scratch),
        compiler_params=pltpu.CompilerParams(
            dimension_semantics=dims,
            vmem_limit_bytes=vmem_limit),
    )(inpt, tar)

    total = jnp.sum(partials[:, 0, 0])
    # torch: mean over the concatenated (N, 2C, (H-4)*(W-4)/C) tensor
    #      == sum / (N * 2 * (H-4) * (W-4)); reshape/cat never change values.
    return total / jnp.float32(N * 2 * (H - 4) * (W - 4))


def _grad_loss_ref(inpt, tar):
    """Pure-JAX reference mirroring the PyTorch math."""
    def grads(img):
        m = jnp.mean(img.astype(jnp.float32), axis=1)    # (N, H, W) channel mean
        H, W = m.shape[1], m.shape[2]
        top, mid, bot = m[:, 1:H - 3, :], m[:, 2:H - 2, :], m[:, 3:H - 1, :]
        l, c, r = slice(1, W - 3), slice(2, W - 2), slice(3, W - 1)
        gx = ((top[:, :, l] - top[:, :, r]) + 2 * (mid[:, :, l] - mid[:, :, r])
              + (bot[:, :, l] - bot[:, :, r]))
        gy = ((top[:, :, l] + 2 * top[:, :, c] + top[:, :, r])
              - (bot[:, :, l] + 2 * bot[:, :, c] + bot[:, :, r]))
        return gy, gx

    gy_t, gx_t = grads(tar)
    gy_i, gx_i = grads(inpt)
    return jnp.mean(jnp.concatenate(
        [jnp.abs(gy_t - gy_i), jnp.abs(gx_t - gx_i)], axis=1))


if __name__ == "__main__":
    key = jax.random.PRNGKey(0)
    ks = jax.random.split(key, 6)

    # 1) Canonical small shape, f32, whole-image blocks, 2 batch grid steps.
    N, C, H, W = 2, 4, 16, 16   # (H-4)*(W-4) divisible by C, as torch's reshape requires
    x = jax.random.normal(ks[0], (N, C, H, W), dtype=jnp.float32)
    y = jax.random.normal(ks[1], (N, C, H, W), dtype=jnp.float32)
    out = jax.block_until_ready(grad_loss(x, y))
    ref = _grad_loss_ref(x, y)
    assert jnp.allclose(out, ref, rtol=1e-5, atol=1e-5), (out, ref)

    # 2) bf16 inputs travel to VMEM in bf16; the f32 cast happens per channel
    #    inside the kernel.
    out_bf = jax.block_until_ready(
        grad_loss(x.astype(jnp.bfloat16), y.astype(jnp.bfloat16)))
    ref_bf = _grad_loss_ref(x.astype(jnp.bfloat16), y.astype(jnp.bfloat16))
    assert jnp.allclose(out_bf, ref_bf, rtol=1e-4, atol=1e-4), (out_bf, ref_bf)

    # 3) Row-tiled path (forced row block): odd batch, H not a multiple of the
    #    row block -> exercises the 8-row carry and the masked partial block.
    N, C, H, W = 5, 3, 20, 40
    x = jax.random.normal(ks[2], (N, C, H, W), dtype=jnp.float32)
    y = jax.random.normal(ks[3], (N, C, H, W), dtype=jnp.float32)
    out = jax.block_until_ready(grad_loss(x, y, _row_block=8))
    ref = _grad_loss_ref(x, y)
    assert jnp.allclose(out, ref, rtol=1e-5, atol=1e-5), (out, ref)

    # 4) Several images per block (gn = 3 divides N = 6), whole-image blocks.
    N, C, H, W = 6, 4, 12, 24
    x = jax.random.normal(ks[4], (N, C, H, W), dtype=jnp.float32)
    y = jax.random.normal(ks[5], (N, C, H, W), dtype=jnp.float32)
    out = jax.block_until_ready(grad_loss(x, y))
    ref = _grad_loss_ref(x, y)
    assert jnp.allclose(out, ref, rtol=1e-5, atol=1e-5), (out, ref)

    print("KERNEL_OK")
</pallas_src>

<mosaic_0001>
module attributes {stable_mosaic.version = 11 : i64} {
  func.func @kernel(%arg0: i32, %arg1: memref<1x4x16x16xf32, #tpu.memory_space<vmem>>, %arg2: memref<1x4x16x16xf32, #tpu.memory_space<vmem>>, %arg3: memref<1x8x128xf32, #tpu.memory_space<vmem>>) attributes {dimension_semantics = [#tpu.dimension_semantics<parallel>], iteration_bounds = array<i64: 2>, scalar_prefetch = 0 : i64, scratch_operands = 0 : i64, tpu.core_type = #tpu.core_type<tc>, window_params = [{transform_indices = @transform_0, window_bounds = array<i64: 1, 4, 16, 16>}, {transform_indices = @transform_1, window_bounds = array<i64: 1, 4, 16, 16>}, {transform_indices = @transform_2, window_bounds = array<i64: 1, 8, 128>}]} {
    %c0 = arith.constant 0 : index
    %c0_0 = arith.constant 0 : index
    %c0_1 = arith.constant 0 : index
    %c0_2 = arith.constant 0 : index
    %0 = vector.load %arg2[%c0, %c0_0, %c0_1, %c0_2] : memref<1x4x16x16xf32, #tpu.memory_space<vmem>>, vector<1x1x16x16xf32>
    %1 = vector.shape_cast %0 : vector<1x1x16x16xf32> to vector<1x16x16xf32>
    %c0_3 = arith.constant 0 : index
    %c1 = arith.constant 1 : index
    %c0_4 = arith.constant 0 : index
    %c0_5 = arith.constant 0 : index
    %2 = vector.load %arg2[%c0_3, %c1, %c0_4, %c0_5] : memref<1x4x16x16xf32, #tpu.memory_space<vmem>>, vector<1x1x16x16xf32>
    %3 = vector.shape_cast %2 : vector<1x1x16x16xf32> to vector<1x16x16xf32>
    %4 = arith.addf %1, %3 : vector<1x16x16xf32>
    %c0_6 = arith.constant 0 : index
    %c2 = arith.constant 2 : index
    %c0_7 = arith.constant 0 : index
    %c0_8 = arith.constant 0 : index
    %5 = vector.load %arg2[%c0_6, %c2, %c0_7, %c0_8] : memref<1x4x16x16xf32, #tpu.memory_space<vmem>>, vector<1x1x16x16xf32>
    %6 = vector.shape_cast %5 : vector<1x1x16x16xf32> to vector<1x16x16xf32>
    %7 = arith.addf %4, %6 : vector<1x16x16xf32>
    %c0_9 = arith.constant 0 : index
    %c3 = arith.constant 3 : index
    %c0_10 = arith.constant 0 : index
    %c0_11 = arith.constant 0 : index
    %8 = vector.load %arg2[%c0_9, %c3, %c0_10, %c0_11] : memref<1x4x16x16xf32, #tpu.memory_space<vmem>>, vector<1x1x16x16xf32>
    %9 = vector.shape_cast %8 : vector<1x1x16x16xf32> to vector<1x16x16xf32>
    %10 = arith.addf %7, %9 : vector<1x16x16xf32>
    %cst = arith.constant 2.500000e-01 : f32
    %11 = vector.broadcast %cst : f32 to vector<1x16x16xf32>
    %12 = arith.mulf %10, %11 : vector<1x16x16xf32>
    %13 = vector.extract_strided_slice %12 {offsets = [0, 0, 0], sizes = [1, 14, 16], strides = [1, 1, 1]} : vector<1x16x16xf32> to vector<1x14x16xf32>
    %14 = vector.extract_strided_slice %12 {offsets = [0, 1, 0], sizes = [1, 14, 16], strides = [1, 1, 1]} : vector<1x16x16xf32> to vector<1x14x16xf32>
    %15 = vector.extract_strided_slice %12 {offsets = [0, 2, 0], sizes = [1, 14, 16], strides = [1, 1, 1]} : vector<1x16x16xf32> to vector<1x14x16xf32>
    %cst_12 = arith.constant 2.000000e+00 : f32
    %16 = vector.broadcast %cst_12 : f32 to vector<1x14x16xf32>
    %17 = arith.mulf %16, %14 : vector<1x14x16xf32>
    %18 = arith.addf %13, %17 : vector<1x14x16xf32>
    %19 = arith.addf %18, %15 : vector<1x14x16xf32>
    %20 = arith.subf %13, %15 : vector<1x14x16xf32>
    %21 = vector.extract_strided_slice %19 {offsets = [0, 0, 0], sizes = [1, 14, 14], strides = [1, 1, 1]} : vector<1x14x16xf32> to vector<1x14x14xf32>
    %22 = vector.extract_strided_slice %19 {offsets = [0, 0, 2], sizes = [1, 14, 14], strides = [1, 1, 1]} : vector<1x14x16xf32> to vector<1x14x14xf32>
    %23 = arith.subf %21, %22 : vector<1x14x14xf32>
    %24 = vector.extract_strided_slice %20 {offsets = [0, 0, 0], sizes = [1, 14, 14], strides = [1, 1, 1]} : vector<1x14x16xf32> to vector<1x14x14xf32>
    %25 = vector.extract_strided_slice %20 {offsets = [0, 0, 1], sizes = [1, 14, 14], strides = [1, 1, 1]} : vector<1x14x16xf32> to vector<1x14x14xf32>
    %cst_13 = arith.constant 2.000000e+00 : f32
    %26 = vector.broadcast %cst_13 : f32 to vector<1x14x14xf32>
    %27 = arith.mulf %26, %25 : vector<1x14x14xf32>
    %28 = arith.addf %24, %27 : vector<1x14x14xf32>
    %29 = vector.extract_strided_slice %20 {offsets = [0, 0, 2], sizes = [1, 14, 14], strides = [1, 1, 1]} : vector<1x14x16xf32> to vector<1x14x14xf32>
    %30 = arith.addf %28, %29 : vector<1x14x14xf32>
    %c0_14 = arith.constant 0 : index
    %c0_15 = arith.constant 0 : index
    %c0_16 = arith.constant 0 : index
    %c0_17 = arith.constant 0 : index
    %31 = vector.load %arg1[%c0_14, %c0_15, %c0_16, %c0_17] : memref<1x4x16x16xf32, #tpu.memory_space<vmem>>, vector<1x1x16x16xf32>
    %32 = vector.shape_cast %31 : vector<1x1x16x16xf32> to vector<1x16x16xf32>
    %c0_18 = arith.constant 0 : index
    %c1_19 = arith.constant 1 : index
    %c0_20 = arith.constant 0 : index
    %c0_21 = arith.constant 0 : index
    %33 = vector.load %arg1[%c0_18, %c1_19, %c0_20, %c0_21] : memref<1x4x16x16xf32, #tpu.memory_space<vmem>>, vector<1x1x16x16xf32>
    %34 = vector.shape_cast %33 : vector<1x1x16x16xf32> to vector<1x16x16xf32>
    %35 = arith.addf %32, %34 : vector<1x16x16xf32>
    %c0_22 = arith.constant 0 : index
    %c2_23 = arith.constant 2 : index
    %c0_24 = arith.constant 0 : index
    %c0_25 = arith.constant 0 : index
    %36 = vector.load %arg1[%c0_22, %c2_23, %c0_24, %c0_25] : memref<1x4x16x16xf32, #tpu.memory_space<vmem>>, vector<1x1x16x16xf32>
    %37 = vector.shape_cast %36 : vector<1x1x16x16xf32> to vector<1x16x16xf32>
    %38 = arith.addf %35, %37 : vector<1x16x16xf32>
    %c0_26 = arith.constant 0 : index
    %c3_27 = arith.constant 3 : index
    %c0_28 = arith.constant 0 : index
    %c0_29 = arith.constant 0 : index
    %39 = vector.load %arg1[%c0_26, %c3_27, %c0_28, %c0_29] : memref<1x4x16x16xf32, #tpu.memory_space<vmem>>, vector<1x1x16x16xf32>
    %40 = vector.shape_cast %39 : vector<1x1x16x16xf32> to vector<1x16x16xf32>
    %41 = arith.addf %38, %40 : vector<1x16x16xf32>
    %cst_30 = arith.constant 2.500000e-01 : f32
    %42 = vector.broadcast %cst_30 : f32 to vector<1x16x16xf32>
    %43 = arith.mulf %41, %42 : vector<1x16x16xf32>
    %44 = vector.extract_strided_slice %43 {offsets = [0, 0, 0], sizes = [1, 14, 16], strides = [1, 1, 1]} : vector<1x16x16xf32> to vector<1x14x16xf32>
    %45 = vector.extract_strided_slice %43 {offsets = [0, 1, 0], sizes = [1, 14, 16], strides = [1, 1, 1]} : vector<1x16x16xf32> to vector<1x14x16xf32>
    %46 = vector.extract_strided_slice %43 {offsets = [0, 2, 0], sizes = [1, 14, 16], strides = [1, 1, 1]} : vector<1x16x16xf32> to vector<1x14x16xf32>
    %cst_31 = arith.constant 2.000000e+00 : f32
    %47 = vector.broadcast %cst_31 : f32 to vector<1x14x16xf32>
    %48 = arith.mulf %47, %45 : vector<1x14x16xf32>
    %49 = arith.addf %44, %48 : vector<1x14x16xf32>
    %50 = arith.addf %49, %46 : vector<1x14x16xf32>
    %51 = arith.subf %44, %46 : vector<1x14x16xf32>
    %52 = vector.extract_strided_slice %50 {offsets = [0, 0, 0], sizes = [1, 14, 14], strides = [1, 1, 1]} : vector<1x14x16xf32> to vector<1x14x14xf32>
    %53 = vector.extract_strided_slice %50 {offsets = [0, 0, 2], sizes = [1, 14, 14], strides = [1, 1, 1]} : vector<1x14x16xf32> to vector<1x14x14xf32>
    %54 = arith.subf %52, %53 : vector<1x14x14xf32>
    %55 = vector.extract_strided_slice %51 {offsets = [0, 0, 0], sizes = [1, 14, 14], strides = [1, 1, 1]} : vector<1x14x16xf32> to vector<1x14x14xf32>
    %56 = vector.extract_strided_slice %51 {offsets = [0, 0, 1], sizes = [1, 14, 14], strides = [1, 1, 1]} : vector<1x14x16xf32> to vector<1x14x14xf32>
    %cst_32 = arith.constant 2.000000e+00 : f32
    %57 = vector.broadcast %cst_32 : f32 to vector<1x14x14xf32>
    %58 = arith.mulf %57, %56 : vector<1x14x14xf32>
    %59 = arith.addf %55, %58 : vector<1x14x14xf32>
    %60 = vector.extract_strided_slice %51 {offsets = [0, 0, 2], sizes = [1, 14, 14], strides = [1, 1, 1]} : vector<1x14x16xf32> to vector<1x14x14xf32>
    %61 = arith.addf %59, %60 : vector<1x14x14xf32>
    %62 = arith.subf %30, %61 : vector<1x14x14xf32>
    %63 = math.absf %62 : vector<1x14x14xf32>
    %64 = arith.subf %23, %54 : vector<1x14x14xf32>
    %65 = math.absf %64 : vector<1x14x14xf32>
    %66 = arith.addf %63, %65 : vector<1x14x14xf32>
    %67 = tpu.iota {dimensions = array<i32: 1>} : vector<1x14x14xi32>
    %68 = tpu.iota {dimensions = array<i32: 2>} : vector<1x14x14xi32>
    %c1_i32 = arith.constant 1 : i32
    %69 = vector.broadcast %c1_i32 : i32 to vector<1x14x14xi32>
    %70 = arith.addi %68, %69 : vector<1x14x14xi32>
    %c1_i32_33 = arith.constant 1 : i32
    %71 = vector.broadcast %c1_i32_33 : i32 to vector<1x14x14xi32>
    %72 = arith.addi %67, %71 : vector<1x14x14xi32>
    %c2_i32 = arith.constant 2 : i32
    %73 = vector.broadcast %c2_i32 : i32 to vector<1x14x14xi32>
    %74 = arith.cmpi sge, %72, %73 : vector<1x14x14xi32>
    %c13_i32 = arith.constant 13 : i32
    %75 = vector.broadcast %c13_i32 : i32 to vector<1x14x14xi32>
    %76 = arith.cmpi sle, %72, %75 : vector<1x14x14xi32>
    %77 = arith.andi %74, %76 : vector<1x14x14xi1>
    %c2_i32_34 = arith.constant 2 : i32
    %78 = vector.broadcast %c2_i32_34 : i32 to vector<1x14x14xi32>
    %79 = arith.cmpi sge, %70, %78 : vector<1x14x14xi32>
    %80 = arith.andi %77, %79 : vector<1x14x14xi1>
    %c13_i32_35 = arith.constant 13 : i32
    %81 = vector.broadcast %c13_i32_35 : i32 to vector<1x14x14xi32>
    %82 = arith.cmpi sle, %70, %81 : vector<1x14x14xi32>
    %83 = arith.andi %80, %82 : vector<1x14x14xi1>
    %cst_36 = arith.constant 0.000000e+00 : f32
    %84 = vector.broadcast %cst_36 : f32 to vector<1x14x14xf32>
    %85 = arith.select %83, %66, %84 : vector<1x14x14xi1>, vector<1x14x14xf32>
    %86 = vector.shape_cast %85 : vector<1x14x14xf32> to vector<1x1x14x14xf32>
    %cst_37 = arith.constant dense<0.000000e+00> : vector<1xf32>
    %87 = vector.multi_reduction <add>, %86, %cst_37 [1, 2, 3] : vector<1x1x14x14xf32> to vector<1xf32>
    %88 = vector.shape_cast %87 : vector<1xf32> to vector<1x1x1x1xf32>
    %89 = vector.extract %88[0, 0, 0, 0] : f32 from vector<1x1x1x1xf32>
    %90 = vector.broadcast %89 : f32 to vector<1x8x128xf32>
    %c0_38 = arith.constant 0 : index
    %c0_39 = arith.constant 0 : index
    %c0_40 = arith.constant 0 : index
    %91 = vector.load %arg3[%c0_38, %c0_39, %c0_40] : memref<1x8x128xf32, #tpu.memory_space<vmem>>, vector<1x8x128xf32>
    tpu.vector_store %arg3[%c0_38, %c0_39, %c0_40], %90 {strides = array<i32>} : memref<1x8x128xf32, #tpu.memory_space<vmem>>, vector<1x8x128xf32>,
    return
  }
  func.func @transform_0(%arg0: i32) -> (i32, i32, i32, i32) {
    %c0_i32 = arith.constant 0 : i32
    %c0_i32_0 = arith.constant 0 : i32
    %c0_i32_1 = arith.constant 0 : i32
    %c0_i32_2 = arith.constant 0 : i32
    return %arg0, %c0_i32, %c0_i32_0, %c0_i32_1 : i32, i32, i32, i32
  }
  func.func @transform_1(%arg0: i32) -> (i32, i32, i32, i32) {
    %c0_i32 = arith.constant 0 : i32
    %c0_i32_0 = arith.constant 0 : i32
    %c0_i32_1 = arith.constant 0 : i32
    %c0_i32_2 = arith.constant 0 : i32
    return %arg0, %c0_i32, %c0_i32_0, %c0_i32_1 : i32, i32, i32, i32
  }
  func.func @transform_2(%arg0: i32) -> (i32, i32, i32) {
    %c0_i32 = arith.constant 0 : i32
    %c0_i32_0 = arith.constant 0 : i32
    %c0_i32_1 = arith.constant 0 : i32
    return %arg0, %c0_i32, %c0_i32_0 : i32, i32, i32
  }
}

</mosaic_0001>

<bundles_post_ra>
// kernel: tpu_custom_call.1
= control target key start
LH: loop header
LB: loop body
LE: loop exit
PB: predicated region body
PF: predicated region fallthrough
CT: control target
= control target key end

     0   :  { %7 = vsyncpa [#allocation3], 0  ;;  %s974_s0 = inlined_call_operand.hbm [shape: f32[2,4,16,16], index: 0, kind: input, shape index: {}]   ;;  %s975_s1 = inlined_call_operand.hbm [shape: f32[2,4,16,16], index: 1, kind: input, shape index: {}]   ;;  %s976_s2 = inlined_call_operand.hbm [shape: f32[2,8,128], index: 2, kind: output, shape index: {}]  }
   0x1   :  { %9 = vsyncpa [#allocation3 + $0x1], 0 }
   0x2   :  { %10 = vsyncpa [#allocation6], 0 }
   0x3   :  { %12 = vsyncpa [#allocation6 + $0x1], 0 }
   0x4   :  { %13 = vsyncpa [#allocation4], 0 }
   0x5   :  { %15 = vsyncpa [#allocation4 + $0x1], 0  ;;  %s741_s9 = smov 0   ;;  %s743_s10 = smov 0  }
   0x6   :  { %s745_s11 = smov 0   ;;  %s747_s12 = smov 0  }
   0x7 LB: > { %s762_s13 = sadd.s32 4294967295, %s717_s12   ;;  %s505_s14 = sadd.s32 4294967294, %s717_s12   ;;  %s717_s12 = sphi %s747_s12, %s992_s12   ;;  %s713_s11 = sphi %s745_s11, %s991_s11   ;;  %s709_s10 = sphi %s743_s10, %s990_s10   ;;  %s705_s9 = sphi %s741_s9, %s989_s9  }
   0x8   : > { %s766_s15 = sadd.s32 1, %s717_s12   ;;  %s28_s16 = sadd.s32 1, %s713_s11 }
   0x9   : > { %s25_s17 = ssub.s32 %s717_s12, %s766_s15  ;;  %p35_p0 = scmp.ne.s32.totalorder %s713_s11, %s709_s10 }
   0xa   : > { %p26_p1 = scmp.eq.s32.totalorder %s25_s17, 0  ;;  %p36_p2 = scmp.eq.s32.totalorder %s717_s12, 0 }
   0xb   : > { %p41_p3 = scmp.ne.s32.totalorder %s709_s10, %s705_s9  ;;  %p42_p4 = scmp.eq.s32.totalorder %s762_s13, 0 }
   0xc   : > { %s778_s18 = scalar_select %p26_p1, %s713_s11, %s28_s16  }
   0xd   : > { %p780_p5 = por %p36_p2, %p35_p0  ;;  %p784_p6 = por %p42_p4, %p41_p3 }
   0xe   : > { %p91_p7 = scmp.eq.s32.totalorder %s762_s13, 1  ;;  %p97_p8 = scmp.eq.s32.totalorder %s505_s14, 1 }
   0xf   : > { %s980_s20 = scalar_select %p784_p6, 1, 0 }
  0x10   : > { %p555_p10 = scmp.lt.s32.totalorder %s717_s12, 2  ;;  %p791_p11 = por %p91_p7, %p35_p0 }
  0x11   : > { %p795_p12 = por %p97_p8, %p41_p3  ;;  %s800_s23 = sand.u32 1, %s713_s11  }
  0x12   : > { %s981_s21 = scalar_select %p791_p11, 1, 0 }
  0x13   : > { %s982_s22 = scalar_select %p795_p12, 1, 0 }
  0x14   : > { %s534_s24 = sshll.u32 %s717_s12, 10  ;;  %s508_s25 = sshll.u32 %s800_s23, 6 }
  0x15   : > { %s809_s28 = scalar_lea.hbm %s974_s0, %s534_s24  ;;  %s121_s29 = scalar_lea.vmem [#allocation2], %s508_s25 }
  0x16   : > { %s128_s30 = sshll.u32 %s121_s29, 4  ;;  %p815_p13 = pnand %p555_p10, %p780_p5  ;;  %s819_s30 = int_to_ptr.vmem [resolvable:$true] %s128_s30 }
  0x17   : > { %s118_s4 = scalar_lea.sflag [#allocation3], %s800_s23  ;;  %s593_s5 = scalar_lea.hbm %s809_s28, 1024 }
  0x18   : > { %p594_p0 = scmp.ne.s32.totalorder %s809_s28, %s593_s5  ;;  %p595_p1 = pneg %p815_p13 }
  0x19   : > { %s598_s8 = scalar_lea.hbm %s974_s0, 2048  ;;  %p599_p4 = scmp.lt.s32.totalorder %s809_s28, %s974_s0 }
  0x1a   : > { %p596_p2 = pnand %p595_p1, %p594_p0  ;;  %p600_p5 = scmp.lt.s32.totalorder %s598_s8, %s593_s5 }
  0x1c   : > { %p597_p3 = pneg %p596_p2  ;;  %p601_p7 = por %p600_p5, %p599_p4 }
  0x1e   : > { %p602_p8 = pnand %p601_p7, %p597_p3 }
  0x20   : > { %605 = shalt.err (!%p602_p8)
}
  0x21   : > { %s606_s17 = scalar_lea.vmem %s819_s30, 1024  ;;  %s719_s19 = smov [#allocation2]  }
  0x22   : > { %p607_p10 = scmp.ne.s32.totalorder %s819_s30, %s606_s17  ;;  %s611_s26 = sshll.u32 %s719_s19, 4  ;;  %s612_s26 = int_to_ptr.vmem [resolvable:$false] %s611_s26 }
  0x23   : > { %s613_s27 = scalar_lea.vmem %s612_s26, 2048  ;;  %p614_p9 = scmp.lt.s32.totalorder %s819_s30, %s612_s26 }
  0x24   : > { %p609_p0 = pnand %p607_p10, %p595_p1  ;;  %p615_p12 = scmp.lt.s32.totalorder %s613_s27, %s606_s17 }
  0x26   : > { %p610_p2 = pneg %p609_p0  ;;  %p616_p11 = por %p615_p12, %p614_p9 }
  0x28   : > { %p617_p4 = pnand %p616_p11, %p610_p2 }
  0x2a   : > { %620 = shalt.err (!%p617_p4)
}
  0x2b   : > { %s720_s29 = smov 128   ;;  %s721_s5 = smov 8  }
  0x2c   : > { %547 = dma.hbm_to_vmem [thread:$0]  (!%p815_p13), %s809_s28, 1024, %s819_s30, %s118_s4, %s720_s29, %s720_s29, %s721_s5  }
  0x2d   : > { %p514_p9 = scmp.ge.s32.totalorder %s717_s12, 1  ;;  %p157_p11 = scmp.lt.s32.totalorder %s717_s12, 3 }
  0x2e   : > { %s862_s14 = scalar_lea.hbm %s975_s1, %s534_s24  ;;  %s142_s16 = scalar_lea.vmem [#allocation5], %s508_s25 }
  0x2f   : > { %p853_p12 = pnand %p514_p9, %p157_p11  ;;  %s149_s17 = sshll.u32 %s142_s16, 4  ;;  %s866_s17 = int_to_ptr.vmem [resolvable:$true] %s149_s17 }
  0x30   : > { %s139_s28 = scalar_lea.sflag [#allocation6], %s800_s23  ;;  %s621_s30 = scalar_lea.hbm %s862_s14, 1024 }
  0x31   : > { %p622_p3 = scmp.ne.s32.totalorder %s862_s14, %s621_s30  ;;  %s626_s24 = scalar_lea.hbm %s975_s1, 2048 }
  0x32   : > { %p627_p8 = scmp.lt.s32.totalorder %s862_s14, %s975_s1  ;;  %p628_p10 = scmp.lt.s32.totalorder %s626_s24, %s621_s30 }
  0x33   : > { %p624_p5 = pnand %p622_p3, %p595_p1 }
  0x34   : > { %p629_p0 = por %p628_p10, %p627_p8 }
  0x35   : > { %p625_p7 = pneg %p624_p5 }
  0x37   : > { %p630_p2 = pnand %p629_p0, %p625_p7 }
  0x39   : > { %633 = shalt.err (!%p630_p2)
}
  0x3a   : > { %s634_s23 = scalar_lea.vmem %s866_s17, 1024  ;;  %s722_s25 = smov [#allocation5]  }
  0x3b   : > { %p635_p4 = scmp.ne.s32.totalorder %s866_s17, %s634_s23  ;;  %s639_s7 = sshll.u32 %s722_s25, 4  ;;  %s640_s7 = int_to_ptr.vmem [resolvable:$false] %s639_s7 }
  0x3c   : > { %s641_s8 = scalar_lea.vmem %s640_s7, 2048  ;;  %p642_p3 = scmp.lt.s32.totalorder %s866_s17, %s640_s7 }
  0x3d   : > { %p637_p9 = pnand %p635_p4, %p595_p1  ;;  %p643_p5 = scmp.lt.s32.totalorder %s641_s8, %s634_s23 }
  0x3f   : > { %p638_p11 = pneg %p637_p9  ;;  %p644_p6 = por %p643_p5, %p642_p3 }
  0x41   : > { %p645_p8 = pnand %p644_p6, %p638_p11 }
  0x43   : > { %648 = shalt.err (!%p645_p8)
}
  0x44   : > { %550 = dma.hbm_to_vmem [thread:$0]  (!%p815_p13), %s862_s14, 1024, %s866_s17, %s139_s28, %s720_s29, %s720_s29, %s721_s5  }
  0x45   : > { %161 = sbr.rel (%p853_p12) target bundleno = 453 (0x1c5), region = 28  ;;  %s897_s16 = sand.u32 (!%p853_p12), 1, %s709_s10  }
  0x46   : > { %s515_s30 = sshll.u32 (!%p853_p12), %s897_s16, 6  ;;  %s164_s4 = scalar_lea.sflag (!%p853_p12), [#allocation3], %s897_s16 }
  0x47   : > { %s901_s19 = scalar_lea.vmem (!%p853_p12), [#allocation2], %s515_s30  ;;  %p985_p6 = scmp.ne.s32.totalorder (!%p853_p12), %s980_s20, 0 }
  0x4a   : > { %692 = dma.done.wait (%p985_p6), %s164_s4, 1024  }
  0x4b   : > { %694 = vsyncadd (%p985_p6), %s164_s4, 4294966272  ;;  %s173_s3 = scalar_lea.sflag [#allocation6], %s897_s16  ;;  %s176_s29 = scalar_lea.vmem [#allocation5], %s515_s30 }
  0x4c   : > { %696 = dma.done.wait (%p985_p6), %s173_s3, 1024  }
  0x4d   : > { %698 = vsyncadd (%p985_p6), %s173_s3, 4294966272  ;;  %v203_v0 = vld [vmem:[%s176_s29 + $0x8] sm:$0xff]  ;;  %v519_v1 = vld [vmem:[%s176_s29 + $0x18] sm:$0xff]  ;;  %vm235_vm0 = vcmask 1045504   ;;  %vm225_vm1 = vcmask 1046528   ;;  %s723_s20 = smov 126  }
  0x4e   : > { %v521_v2 = vld [vmem:[%s176_s29 + $0x28] sm:$0xff]  ;;  %v208_v3 = vadd.f32 %v519_v1, %v203_v0  ;;  %v202_v4 = vld [vmem:[%s176_s29] sm:$0xff]  ;;  %v518_v5 = vld [vmem:[%s176_s29 + $0x10] sm:$0xff]  ;;  %s724_s5 = smov 127   ;;  %vm384_vm10 = vcmask 111616   ;;  %vm382_vm11 = vcmask 113664  }
  0x4f   : > { %v523_v6 = vld [vmem:[%s176_s29 + $0x38] sm:$0xff]  ;;  %v207_v7 = vadd.f32 %v518_v5, %v202_v4  ;;  %v520_v8 = vld [vmem:[%s176_s29 + $0x20] sm:$0xff]  ;;  %v278_v9 = vld [vmem:[%s901_s19 + $0x8] sm:$0xff]  ;;  %s517_s6 = sshll.u32 %s897_s16, 3  ;;  %s531_s28 = sshll.u32 %s762_s13, 7 }
  0x50   : > { %v213_v10 = vadd.f32 %v521_v2, %v208_v3  ;;  %v522_v11 = vld [vmem:[%s176_s29 + $0x30] sm:$0xff]  ;;  %v525_v12 = vld [vmem:[%s901_s19 + $0x18] sm:$0xff]  ;;  %v527_v13 = vld [vmem:[%s901_s19 + $0x28] sm:$0xff]  ;;  %v360_v3 = vlaneseq  ;;  %s201_s14 = scalar_lea.vmem [#allocation7], %s517_s6  ;;  %s410_s23 = scalar_lea.hbm %s976_s2, %s531_s28 }
  0x51   : > { %v212_v14 = vadd.f32 %v520_v8, %v207_v7  ;;  %v283_v15 = vadd.f32 %v525_v12, %v278_v9  ;;  %v277_v16 = vld [vmem:[%s901_s19] sm:$0xff]  ;;  %v524_v17 = vld [vmem:[%s901_s19 + $0x10] sm:$0xff]  ;;  %v529_v20 = vld [vmem:[%s901_s19 + $0x38] sm:$0xff]  ;;  %s412_s17 = sshll.u32 %s201_s14, 4  ;;  %s399_s25 = scalar_lea.sflag [#allocation4], %s897_s16  ;;  %s934_s17 = int_to_ptr.vmem [resolvable:$true] %s412_s17 }
  0x52   : > { %v526_v18 = vld [vmem:[%s901_s19 + $0x20] sm:$0xff]  ;;  %v218_v19 = vadd.f32 %v523_v6, %v213_v10  ;;  %v282_v21 = vadd.f32 %v524_v17, %v277_v16  ;;  %v528_v24 = vld [vmem:[%s901_s19 + $0x30] sm:$0xff]  ;;  %v361_v6 = vshrl.u32 %v360_v3, 7  ;;  %v364_v10 = vand.u32 127, %v360_v3  ;;  %s649_s7 = scalar_lea.vmem %s934_s17, 128  ;;  %p986_p1 = scmp.ne.s32.totalorder %s981_s21, 0 }
  0x53   : > { %v217_v22 = vadd.f32 %v522_v11, %v212_v14  ;;  %v288_v23 = vadd.f32 %v527_v13, %v283_v15  ;;  %p650_p13 = scmp.ne.s32.totalorder %s934_s17, %s649_s7  ;;  %s725_s8 = smov [#allocation7]  }
  0x54   : > { %v220_v25 = vmul.f32 0.25, %v218_v19  ;;  %v287_v26 = vadd.f32 %v526_v18, %v282_v21  ;;  %v362_v9 = vadd.s32 8, %v361_v6  ;;  %v365_v13 = vadd.s32 1, %v364_v10  ;;  %s653_s13 = sshll.u32 %s725_s8, 4  ;;  %s654_s13 = int_to_ptr.vmem [resolvable:$false] %s653_s13 }
  0x55   : > { %v219_v27 = vmul.f32 0.25, %v217_v22  ;;  %v293_v28 = vadd.f32 %v529_v20, %v288_v23  ;;  %v366_v18 = vadd.s32 1, %v361_v6  ;;  %p651_p12 = pnand %p650_p13, %p986_p1  ;;  %s655_s30 = scalar_lea.vmem %s654_s13, 256 }
  0x56   : > { %v237_v29 = vrot.slane %v220_v25, 2  ;;  %v292_v30 = vadd.f32 %v528_v24, %v287_v26  ;;  %v222_v31 = vmul.f32 2.0, %v220_v25  ;;  %v367_v14 = vadd.s32 1, %v362_v9  ;;  %p656_p10 = scmp.lt.s32.totalorder %s934_s17, %s654_s13  ;;  %p657_p0 = scmp.lt.s32.totalorder %s655_s30, %s649_s7 }
  0x57   : > { %v236_v32 = vrot.slane %v219_v27, 2  ;;  %v295_v33 = vmul.f32 0.25, %v293_v28  ;;  %v221_v34 = vmul.f32 2.0, %v219_v27  ;;  %vm374_vm3 = vcmp.ge.s32.totalorder %v365_v13, 2  ;;  %p652_p7 = pneg %p651_p12 }
  0x58   : > { %v244_v35 = vsub.f32 %v220_v25, %v237_v29  ;;  %v294_v36 = vmul.f32 0.25, %v292_v30  ;;  %v227_v37 = vrot.slane %v222_v31, 1  ;;  %vm371_vm2 = vcmp.le.s32.totalorder %v367_v14, 13  ;;  %p658_p2 = por %p657_p0, %p656_p10 }
  0x59   : > { %v238_v38 = vsel %vm235_vm0, %v236_v32, %v237_v29  ;;  %v310_v39 = vrot.slane %v295_v33, 2  ;;  %v226_v40 = vrot.slane %v221_v34, 1  ;;  %v297_v41 = vmul.f32 2.0, %v295_v33  ;;  %vm376_vm5 = vmand %vm371_vm2, %vm374_vm3 }
  0x5a   : > { %271 = vrot.lane.b32.xlu1 %v244_v35, %s723_s20  ;;  %v243_v42 = vsub.f32 %v219_v27, %v238_v38  ;;  %v309_v43 = vrot.slane %v294_v36, 2  ;;  %v296_v45 = vmul.f32 2.0, %v294_v36  ;;  %v256_v46 = vmul.f32 2.0, %v244_v35  ;;  %p659_p4 = pnand %p658_p2, %p652_p7 }
  0x5b   : > { %v317_v44 = vsub.f32 %v295_v33, %v310_v39  ;;  %v228_v48 = vsel %vm225_vm1, %v226_v40, %v227_v37  ;;  %v301_v51 = vrot.slane %v297_v41, 1  ;;  %v232_v54 = vadd.f32 %v227_v37, %v220_v25 }
  0x5c   : > { %269 = vrot.lane.b32.xlu0 %v243_v42, %s723_s20  ;;  %v311_v47 = vsel %vm235_vm0, %v309_v43, %v310_v39  ;;  %v300_v52 = vrot.slane %v296_v45, 1  ;;  %v255_v55 = vmul.f32 2.0, %v243_v42  ;;  %v231_v56 = vadd.f32 %v228_v48, %v219_v27 }
  0x5d   : > { %v329_v49 = vmul.f32 2.0, %v317_v44  ;;  %v316_v50 = vsub.f32 %v294_v36, %v311_v47  ;;  %v242_v58 = vadd.f32 %v237_v29, %v232_v54  ;;  %v306_v59 = vadd.f32 %v301_v51, %v295_v33 }
  0x5e   : > { %v302_v57 = vsel %vm225_vm1, %v300_v52, %v301_v51  ;;  %v241_v60 = vadd.f32 %v238_v38, %v231_v56  ;;  %vm368_vm4 = vcmp.ge.s32.totalorder %v366_v18, 2  ;;  %vm377_vm6 = vcmp.le.s32.totalorder %v365_v13, 13 }
  0x5f   : > { %334 = vrot.lane.b32.xlu1 %v329_v49, %s724_s5  ;;  %v328_v53 = vmul.f32 2.0, %v316_v50  ;;  %v305_v61 = vadd.f32 %v302_v57, %v294_v36  ;;  %v315_v62 = vadd.f32 %v310_v39, %v306_v59  ;;  %vm375_vm7 = vmand %vm368_vm4, %vm374_vm3 }
  0x60   : > { %261 = vrot.lane.b32.xlu0 %v256_v46, %s724_s5  ;;  %vm379_vm8 = vmand %vm376_vm5, %vm377_vm6 }
  0x61   : > { %v314_v63 = vadd.f32 %v311_v47, %v305_v61  ;;  %vm378_vm9 = vmand %vm375_vm7, %vm377_vm6 }
  0x63   : > { %332 = vrot.lane.b32.xlu1 %v328_v53, %s724_s5 }
  0x64   : > { %259 = vrot.lane.b32.xlu0 %v255_v55, %s724_s5 }
  0x67   : > { %249 = vrot.lane.b32.xlu1 %v242_v58, %s723_s20 }
  0x68   : > { %247 = vrot.lane.b32.xlu0 %v241_v60, %s723_s20 }
  0x6b   : > { %322 = vrot.lane.b32.xlu1 %v315_v62, %s723_s20 }
  0x6c   : > { %320 = vrot.lane.b32.xlu0 %v314_v63, %s723_s20 }
  0x6f   : > { %344 = vrot.lane.b32.xlu1 %v317_v44, %s723_s20 }
  0x70   : > { %342 = vrot.lane.b32.xlu0 %v316_v50, %s723_s20 }
  0xcc   : > { %v272_v0 = vpop.permute.xlu1 %271 }
  0xce   : > { %v270_v1 = vpop.permute.xlu0 %269 }
  0xd1   : > { %v335_v2 = vpop.permute.xlu1 %334 }
  0xd2   : > { %v262_v4 = vpop.permute.xlu0 %261  ;;  %v339_v21 = vadd.f32 %v335_v2, %v317_v44 }
  0xd3   : > { %v266_v15 = vadd.f32 %v262_v4, %v244_v35 }
  0xd5   : > { %v333_v5 = vpop.permute.xlu1 %332  ;;  %v276_v26 = vadd.f32 %v272_v0, %v266_v15 }
  0xd6   : > { %v260_v7 = vpop.permute.xlu0 %259  ;;  %v338_v23 = vadd.f32 %v333_v5, %v316_v50 }
  0xd7   : > { %v265_v19 = vadd.f32 %v260_v7, %v243_v42 }
  0xd9   : > { %v250_v8 = vpop.permute.xlu1 %249  ;;  %v275_v30 = vadd.f32 %v270_v1, %v265_v19 }
  0xda   : > { %v248_v11 = vpop.permute.xlu0 %247  ;;  %v254_v22 = vsub.f32 %v242_v58, %v250_v8 }
  0xdb   : > { %v253_v24 = vsub.f32 %v241_v60, %v248_v11 }
  0xdd   : > { %v323_v12 = vpop.permute.xlu1 %322 }
  0xde   : > { %v327_v16 = vsub.f32 %v315_v62, %v323_v12  ;;  %v321_v17 = vpop.permute.xlu0 %320 }
  0xdf   : > { %v326_v20 = vsub.f32 %v314_v63, %v321_v17 }
  0xe0   : > { %v355_v27 = vsub.f32 %v254_v22, %v327_v16 }
  0xe1   : > { %v345_v25 = vpop.permute.xlu1 %344  ;;  %v354_v31 = vsub.f32 %v253_v24, %v326_v20 }
  0xe2   : > { %v349_v28 = vadd.f32 %v345_v25, %v339_v21  ;;  %v343_v29 = vpop.permute.xlu0 %342  ;;  %v357_v35 = vand.u32 2147483647, %v355_v27 }
  0xe3   : > { %v348_v32 = vadd.f32 %v343_v29, %v338_v23  ;;  %v356_v37 = vand.u32 2147483647, %v354_v31 }
  0xe4   : > { %v351_v33 = vsub.f32 %v276_v26, %v349_v28 }
  0xe5   : > { %v350_v34 = vsub.f32 %v275_v30, %v348_v32 }
  0xe6   : > { %v353_v36 = vand.u32 2147483647, %v351_v33 }
  0xe7   : > { %v352_v38 = vand.u32 2147483647, %v350_v34 }
  0xe8   : > { %v359_v39 = vadd.f32 %v357_v35, %v353_v36 }
  0xe9   : > { %v358_v40 = vadd.f32 %v356_v37, %v352_v38 }
  0xea   : > { %v381_v41 = vsel %vm379_vm8, %v359_v39, 0.0 }
  0xeb   : > { %v380_v42 = vsel %vm378_vm9, %v358_v40, 0.0  ;;  %v385_v43 = vsel %vm384_vm10, %v381_v41, 0.0 }
  0xec   : > { %v383_v44 = vsel %vm382_vm11, %v380_v42, 0.0 }
  0xed   : > { %v386_v45 = vadd.f32 %v385_v43, %v383_v44 }
  0xef   : > { %387 = vadd.xlane.f32.xlu0 %v386_v45 }
 0x178   : > { %v388_v46 = vpop.xlane.xlu0 %387 }
 0x179   : > { %v389_v47 = vrot.slane %v388_v46, 4 }
 0x17b   : > { %v390_v48 = vadd.f32 %v389_v47, %v388_v46 }
 0x17d   : > { %v391_v49 = vrot.slane %v390_v48, 2 }
 0x17f   : > { %v392_v50 = vadd.f32 %v391_v49, %v390_v48 }
 0x181   : > { %v393_v51 = vrot.slane %v392_v50, 1 }
 0x183   : > { %v394_v52 = vadd.f32 %v393_v51, %v392_v50 }
 0x185   : > { %536 = vpush %v394_v52 }
 0x1b6   : > { %s537_s24 = spop %536 }
 0x1b7   : > { %v396_v53 = vstv %s537_s24 }
 0x1b8   : > { %397 = vst [vmem:[%s201_s14] sm:$0xff] %v396_v53 }
 0x1b9   : > { %662 = shalt.err (!%p659_p4)
}
 0x1ba   : > { %s663_s4 = scalar_lea.hbm %s410_s23, 128  ;;  %s667_s3 = scalar_lea.hbm %s976_s2, 256 }
 0x1bb   : > { %p664_p9 = scmp.ne.s32.totalorder %s410_s23, %s663_s4  ;;  %p668_p5 = scmp.lt.s32.totalorder %s410_s23, %s976_s2 }
 0x1bc   : > { %p669_p8 = scmp.lt.s32.totalorder %s667_s3, %s663_s4 }
 0x1bd   : > { %p665_p11 = pnand %p664_p9, %p986_p1 }
 0x1be   : > { %p670_p6 = por %p669_p8, %p668_p5 }
 0x1bf   : > { %p666_p3 = pneg %p665_p11 }
 0x1c1   : > { %p671_p13 = pnand %p670_p6, %p666_p3 }
 0x1c3   : > { %674 = shalt.err (!%p671_p13)
}
 0x1c4   : > { %542 = dma.vmem_to_hbm [thread:$0]  (%p986_p1), %s934_s17, 128, %s410_s23, %s399_s25  }
 0x1c5 PF: > { %s424_s5 = sand.u32 1, %s705_s9   ;;  %p987_p12 = scmp.ne.s32.totalorder %s982_s22, 0 }
 0x1c6   : > { %p988_p7 = scmp.ge.s32.totalorder %s717_s12, 2  ;;  %s425_s6 = scalar_lea.sflag [#allocation4], %s424_s5 }
 0x1c8   : > { %p552_p10 = pnand %p988_p7, %p987_p12 }
 0x1ca   : > { %p553_p0 = pneg %p552_p10 }
 0x1cc   : > { %700 = dma.done.wait (%p553_p0), %s425_s6, 128  }
 0x1cd   : > { %702 = vsyncadd (%p553_p0), %s425_s6, 4294967168  ;;  %p18_p2 = scmp.ge.s32.totalorder %s766_s15, 4   ;;  %s989_s9 = smov %s709_s10 }
 0x1ce   : > { %s990_s10 = smov %s713_s11  ;;  %s991_s11 = smov %s778_s18 }
 0x1cf   : > { %s992_s12 = smov %s766_s15  ;;  %20 = sbr.rel (!%p18_p2) target bundleno = 7 (0x7), region = 92 }
 0x1d4   :  { %430 = vsyncpa [#allocation3], 1 }
 0x1d5   :  { %432 = vsyncpa [#allocation3 + $0x1], 1 }
 0x1d6   :  { %433 = vsyncpa [#allocation6], 1 }
 0x1d7   :  { %435 = vsyncpa [#allocation6 + $0x1], 1 }
 0x1d8   :  { %436 = vsyncpa [#allocation4], 1 }
 0x1d9   :  { %438 = vsyncpa [#allocation4 + $0x1], 1 }

</bundles_post_ra>
